<compile_context>
chip_gen: v7x
topology: tpu7x:2x2x1
jax: 0.10.0
libtpu: 0.0.40
codegen_flags: <defaults>
</compile_context>

<pallas_src>
import functools

import jax
import jax.numpy as jnp
from jax.experimental import pallas as pl
from jax.experimental.pallas import tpu as pltpu

_SUBLANES = 8
_LANES = 128
_SAMPLE_ALIGN = _SUBLANES * _LANES  # 1024 samples: keeps (8,128) layout rules trivially satisfied


def _static_pow(d, gamma):
    """(1 - p)^gamma without exp/log when gamma is a small non-negative integer."""
    g = float(gamma)
    if g.is_integer() and 0.0 <= g <= 16.0:
        gi = int(g)
        if gi == 0:
            return jnp.ones_like(d)
        out = d
        for _ in range(gi - 1):
            out = out * d
        return out
    return jnp.power(d, g)  # d already clamped to [0, 1]


def _focal_loss_kernel(n_ref, t_ref, x_ref, a_ref, o_ref, *, gamma):
    """One batch tile: logits (C, 8, TL), targets (8, TL) -> partial loss sum (1, 1)."""
    x = x_ref[...]                          # (C, 8, TL) f32 logits, class-major, sublane-packed
    t = t_ref[...]                          # (8, TL)    i32 target ids
    a = a_ref[...]                          # (C, 1, 1)  f32 per-class alpha (VMEM resident)
    c = x.shape[0]
    sub, tl = t.shape

    # log-sum-exp over the class axis: leading-dim slices -> plain VPU max/adds.
    m = x[0]
    for k in range(1, c):
        m = jnp.maximum(m, x[k])
    sum_e = jnp.exp(x[0] - m)
    for k in range(1, c):
        sum_e = sum_e + jnp.exp(x[k] - m)

    # Gather target logit and per-class alpha with per-sample select chains
    # (no (C,T) one-hot mask multiply / class-axis reduction).
    x_t = x[0]
    alpha_t = jnp.broadcast_to(a[0], m.shape)
    for k in range(1, c):
        eq = t == k
        x_t = jnp.where(eq, x[k], x_t)
        alpha_t = jnp.where(eq, a[k], alpha_t)

    log_p = (x_t - m) - jnp.log(sum_e)      # log softmax[target]
    probs = jnp.exp(log_p)                  # softmax[target]: EUP exp, no divide, no e*mask
    dp = jnp.clip(1.0 - probs, 0.0, 1.0)
    focal = _static_pow(dp, gamma)

    # NaN-safe masking of padded rows and partial-last-block garbage.
    # Sample index = global_lane * 8 + sublane; n comes from SMEM (scalar prefetch).
    lanes = pl.program_id(0) * tl + jax.lax.broadcasted_iota(jnp.int32, (sub, tl), 1)
    subs = jax.lax.broadcasted_iota(jnp.int32, (sub, tl), 0)
    valid = lanes * sub + subs < n_ref[0]
    loss = jnp.where(valid, -alpha_t * focal * log_p, 0.0)

    psum = jnp.sum(loss, axis=1, keepdims=True)         # (8, 1)  lane reduce (once per big tile)
    o_ref[...] = jnp.sum(psum, axis=0, keepdims=True)   # (1, 1)  sublane reduce


def _vmem_capacity_bytes():
    """Best-effort physical VMEM query; conservative (v7x-safe) fallback."""
    try:
        info = pltpu.get_tpu_info()
        v = int(getattr(info, "vmem_capacity_bytes", 0))
        if v > 0:
            return v
    except Exception:
        pass
    return 64 * 1024 * 1024


@functools.partial(jax.jit, static_argnames=("gamma", "size_average", "tile_lanes"))
def _focal_loss_impl(inputs, targets, alpha_vec, gamma, size_average, tile_lanes):
    n, c = inputs.shape

    # Pad the batch to a multiple of 1024 and pack: logits (C, 8, L), targets (8, L),
    # sample index = lane*8 + sublane.  Under jit this is one fused pad+transpose copy.
    n_pad = max(_SAMPLE_ALIGN, ((n + _SAMPLE_ALIGN - 1) // _SAMPLE_ALIGN) * _SAMPLE_ALIGN)
    lanes_total = n_pad // _SUBLANES
    x_p = jnp.pad(inputs.astype(jnp.float32), ((0, n_pad - n), (0, 0)))
    x_packed = x_p.reshape(lanes_total, _SUBLANES, c).transpose(2, 1, 0)       # (C, 8, L)
    t_p = jnp.pad(targets.astype(jnp.int32).reshape(-1), (0, n_pad - n))
    t_packed = t_p.reshape(lanes_total, _SUBLANES).T                           # (8, L)
    a3 = alpha_vec.astype(jnp.float32).reshape(c, 1, 1)

    # Generation-aware tile sizing: keep the double-buffered (logits+targets) footprint
    # ~16 MiB on small-VMEM chips (v7x) and ~32 MiB on 128-MiB chips (v5e/v6e).
    vmem_phys = _vmem_capacity_bytes()
    bytes_per_lane = 2 * _SUBLANES * 4 * (c + 1)          # double-buffered logits + targets
    if tile_lanes is None:
        footprint_target = 16 * 2**20 if vmem_phys <= 64 * 2**20 else 32 * 2**20
        tl = max(_LANES, (footprint_target // bytes_per_lane) // _LANES * _LANES)
    else:
        tl = max(_LANES, (int(tile_lanes) // _LANES) * _LANES)
    tl = min(tl, lanes_total)                              # both are multiples of 128
    num_tiles = (lanes_total + tl - 1) // tl               # partial last block is OK (masked)

    needed = bytes_per_lane * tl
    vmem_limit = int(min(max(32 * 2**20, needed + 8 * 2**20), vmem_phys))

    n_arr = jnp.array([n], dtype=jnp.int32)                # true batch size, lands in SMEM
    kernel = functools.partial(_focal_loss_kernel, gamma=float(gamma))

    partials = pl.pallas_call(
        kernel,
        out_shape=jax.ShapeDtypeStruct((num_tiles, 1, 1), jnp.float32),
        grid_spec=pltpu.PrefetchScalarGridSpec(
            num_scalar_prefetch=1,
            grid=(num_tiles,),
            in_specs=[
                pl.BlockSpec((_SUBLANES, tl), lambda i, n_s: (0, i)),          # targets
                pl.BlockSpec((c, _SUBLANES, tl), lambda i, n_s: (0, 0, i)),    # logits
                pl.BlockSpec((c, 1, 1), lambda i, n_s: (0, 0, 0)),             # alpha (resident)
            ],
            out_specs=pl.BlockSpec((None, 1, 1), lambda i, n_s: (i, 0, 0)),
        ),
        compiler_params=pltpu.CompilerParams(
            dimension_semantics=("parallel",),             # shards tiles across TCs on v7x
            vmem_limit_bytes=vmem_limit,
        ),
    )(n_arr, t_packed, x_packed, a3)

    total = jnp.sum(partials)
    if size_average:
        total = total / jnp.float32(n)
    return total


def focal_loss(inputs, targets, alpha=None, gamma=2.0, size_average=True, tile_lanes=None):
    """inputs: (N, C) float logits; targets: (N,) int class ids."""
    _, c = inputs.shape
    if alpha is None:
        a = jnp.ones((c,), dtype=jnp.float32)              # matches torch.ones(class_num, 1)
    else:
        a = jnp.asarray(alpha, dtype=jnp.float32).reshape(-1)
    return _focal_loss_impl(inputs, targets, a, gamma=float(gamma),
                            size_average=bool(size_average), tile_lanes=tile_lanes)


def _reference_focal_loss(inputs, targets, alpha, gamma, size_average=True):
    # Pure-JAX reference mirroring the PyTorch module.
    x = inputs.astype(jnp.float32)
    p = jax.nn.softmax(x, axis=1)
    _, c = x.shape
    mask = jax.nn.one_hot(targets, c, dtype=jnp.float32)
    probs = jnp.sum(p * mask, axis=1, keepdims=True)
    a = jnp.asarray(alpha, jnp.float32).reshape(-1)[targets].reshape(-1, 1)
    log_p = jnp.log(probs)
    batch_loss = -a * jnp.power(1.0 - probs, gamma) * log_p
    return jnp.mean(batch_loss) if size_average else jnp.sum(batch_loss)


if __name__ == "__main__":
    key = jax.random.PRNGKey(0)
    k1, k2, k3, k4 = jax.random.split(key, 4)

    # Test 1: module defaults (alpha=ones, gamma=2, size_average=True), small shapes.
    N1, C1 = 8, 4
    x1 = jax.random.normal(k1, (N1, C1), dtype=jnp.float32)
    t1 = jax.random.randint(k2, (N1,), 0, C1, dtype=jnp.int32)
    loss1 = jax.block_until_ready(focal_loss(x1, t1, gamma=2.0, size_average=True))
    ref1 = _reference_focal_loss(x1, t1, jnp.ones((C1, 1), jnp.float32), 2.0, True)
    assert jnp.allclose(loss1, ref1, rtol=1e-5, atol=1e-6), (loss1, ref1)

    # Test 2: multi-tile grid with a partial last block, custom per-class alpha,
    # integer gamma=3, sum reduction (tile_lanes forced small to exercise tiling).
    N2, C2 = 2500, 10
    x2 = 3.0 * jax.random.normal(k3, (N2, C2), dtype=jnp.float32)
    t2 = jax.random.randint(k4, (N2,), 0, C2, dtype=jnp.int32)
    a2 = jnp.linspace(0.25, 1.75, C2, dtype=jnp.float32).reshape(C2, 1)
    loss2 = jax.block_until_ready(
        focal_loss(x2, t2, alpha=a2, gamma=3.0, size_average=False, tile_lanes=256))
    ref2 = _reference_focal_loss(x2, t2, a2, 3.0, False)
    assert jnp.allclose(loss2, ref2, rtol=1e-4, atol=1e-4), (loss2, ref2)

    print("KERNEL_OK")
</pallas_src>

<mosaic_0001>
module attributes {stable_mosaic.version = 11 : i64} {
  func.func @_focal_loss_kernel(%arg0: i32, %arg1: memref<1xi32, #tpu.memory_space<smem>>, %arg2: memref<8x128xi32, #tpu.memory_space<vmem>>, %arg3: memref<4x8x128xf32, #tpu.memory_space<vmem>>, %arg4: memref<4x1x1xf32, #tpu.memory_space<vmem>>, %arg5: memref<1x1x1xf32, #tpu.memory_space<vmem>>) attributes {dimension_semantics = [#tpu.dimension_semantics<parallel>], iteration_bounds = array<i64: 1>, scalar_prefetch = 1 : i64, scratch_operands = 0 : i64, tpu.core_type = #tpu.core_type<tc>, window_params = [{transform_indices = @transform_0, window_bounds = array<i64: 8, 128>}, {transform_indices = @transform_1, window_bounds = array<i64: 4, 8, 128>}, {pipeline_mode = #tpu.pipeline_mode<synchronous>, transform_indices = @transform_2, window_bounds = array<i64: 4, 1, 1>}, {transform_indices = @transform_3, window_bounds = array<i64: 1, 1, 1>}]} {
    %c0 = arith.constant 0 : index
    %c0_0 = arith.constant 0 : index
    %c0_1 = arith.constant 0 : index
    %0 = vector.load %arg3[%c0, %c0_0, %c0_1] : memref<4x8x128xf32, #tpu.memory_space<vmem>>, vector<4x8x128xf32>
    %c0_2 = arith.constant 0 : index
    %c0_3 = arith.constant 0 : index
    %1 = vector.load %arg2[%c0_2, %c0_3] : memref<8x128xi32, #tpu.memory_space<vmem>>, vector<8x128xi32>
    %c0_4 = arith.constant 0 : index
    %c0_5 = arith.constant 0 : index
    %c0_6 = arith.constant 0 : index
    %2 = vector.load %arg4[%c0_4, %c0_5, %c0_6] : memref<4x1x1xf32, #tpu.memory_space<vmem>>, vector<4x1x1xf32>
    %3 = vector.extract_strided_slice %0 {offsets = [0, 0, 0], sizes = [1, 8, 128], strides = [1, 1, 1]} : vector<4x8x128xf32> to vector<1x8x128xf32>
    %4 = vector.shape_cast %3 : vector<1x8x128xf32> to vector<8x128xf32>
    %5 = vector.extract_strided_slice %0 {offsets = [1, 0, 0], sizes = [1, 8, 128], strides = [1, 1, 1]} : vector<4x8x128xf32> to vector<1x8x128xf32>
    %6 = vector.shape_cast %5 : vector<1x8x128xf32> to vector<8x128xf32>
    %7 = arith.maximumf %4, %6 : vector<8x128xf32>
    %8 = vector.extract_strided_slice %0 {offsets = [2, 0, 0], sizes = [1, 8, 128], strides = [1, 1, 1]} : vector<4x8x128xf32> to vector<1x8x128xf32>
    %9 = vector.shape_cast %8 : vector<1x8x128xf32> to vector<8x128xf32>
    %10 = arith.maximumf %7, %9 : vector<8x128xf32>
    %11 = vector.extract_strided_slice %0 {offsets = [3, 0, 0], sizes = [1, 8, 128], strides = [1, 1, 1]} : vector<4x8x128xf32> to vector<1x8x128xf32>
    %12 = vector.shape_cast %11 : vector<1x8x128xf32> to vector<8x128xf32>
    %13 = arith.maximumf %10, %12 : vector<8x128xf32>
    %14 = vector.extract_strided_slice %0 {offsets = [0, 0, 0], sizes = [1, 8, 128], strides = [1, 1, 1]} : vector<4x8x128xf32> to vector<1x8x128xf32>
    %15 = vector.shape_cast %14 : vector<1x8x128xf32> to vector<8x128xf32>
    %16 = arith.subf %15, %13 : vector<8x128xf32>
    %17 = math.exp %16 : vector<8x128xf32>
    %18 = vector.extract_strided_slice %0 {offsets = [1, 0, 0], sizes = [1, 8, 128], strides = [1, 1, 1]} : vector<4x8x128xf32> to vector<1x8x128xf32>
    %19 = vector.shape_cast %18 : vector<1x8x128xf32> to vector<8x128xf32>
    %20 = arith.subf %19, %13 : vector<8x128xf32>
    %21 = math.exp %20 : vector<8x128xf32>
    %22 = arith.addf %17, %21 : vector<8x128xf32>
    %23 = vector.extract_strided_slice %0 {offsets = [2, 0, 0], sizes = [1, 8, 128], strides = [1, 1, 1]} : vector<4x8x128xf32> to vector<1x8x128xf32>
    %24 = vector.shape_cast %23 : vector<1x8x128xf32> to vector<8x128xf32>
    %25 = arith.subf %24, %13 : vector<8x128xf32>
    %26 = math.exp %25 : vector<8x128xf32>
    %27 = arith.addf %22, %26 : vector<8x128xf32>
    %28 = vector.extract_strided_slice %0 {offsets = [3, 0, 0], sizes = [1, 8, 128], strides = [1, 1, 1]} : vector<4x8x128xf32> to vector<1x8x128xf32>
    %29 = vector.shape_cast %28 : vector<1x8x128xf32> to vector<8x128xf32>
    %30 = arith.subf %29, %13 : vector<8x128xf32>
    %31 = math.exp %30 : vector<8x128xf32>
    %32 = arith.addf %27, %31 : vector<8x128xf32>
    %33 = vector.extract_strided_slice %0 {offsets = [0, 0, 0], sizes = [1, 8, 128], strides = [1, 1, 1]} : vector<4x8x128xf32> to vector<1x8x128xf32>
    %34 = vector.shape_cast %33 : vector<1x8x128xf32> to vector<8x128xf32>
    %35 = vector.extract_strided_slice %2 {offsets = [0, 0, 0], sizes = [1, 1, 1], strides = [1, 1, 1]} : vector<4x1x1xf32> to vector<1x1x1xf32>
    %36 = vector.shape_cast %35 : vector<1x1x1xf32> to vector<1x1xf32>
    %37 = vector.shape_cast %36 : vector<1x1xf32> to vector<1x1xf32>
    %38 = vector.broadcast %37 : vector<1x1xf32> to vector<8x128xf32>
    %c1_i32 = arith.constant 1 : i32
    %39 = vector.broadcast %c1_i32 : i32 to vector<8x128xi32>
    %40 = arith.cmpi eq, %1, %39 : vector<8x128xi32>
    %41 = vector.extract_strided_slice %0 {offsets = [1, 0, 0], sizes = [1, 8, 128], strides = [1, 1, 1]} : vector<4x8x128xf32> to vector<1x8x128xf32>
    %42 = vector.shape_cast %41 : vector<1x8x128xf32> to vector<8x128xf32>
    %43 = arith.select %40, %42, %34 : vector<8x128xi1>, vector<8x128xf32>
    %44 = vector.extract_strided_slice %2 {offsets = [1, 0, 0], sizes = [1, 1, 1], strides = [1, 1, 1]} : vector<4x1x1xf32> to vector<1x1x1xf32>
    %45 = vector.shape_cast %44 : vector<1x1x1xf32> to vector<1x1xf32>
    %46 = vector.shape_cast %45 : vector<1x1xf32> to vector<1x1xf32>
    %47 = vector.broadcast %46 : vector<1x1xf32> to vector<8x128xf32>
    %48 = arith.select %40, %47, %38 : vector<8x128xi1>, vector<8x128xf32>
    %c2_i32 = arith.constant 2 : i32
    %49 = vector.broadcast %c2_i32 : i32 to vector<8x128xi32>
    %50 = arith.cmpi eq, %1, %49 : vector<8x128xi32>
    %51 = vector.extract_strided_slice %0 {offsets = [2, 0, 0], sizes = [1, 8, 128], strides = [1, 1, 1]} : vector<4x8x128xf32> to vector<1x8x128xf32>
    %52 = vector.shape_cast %51 : vector<1x8x128xf32> to vector<8x128xf32>
    %53 = arith.select %50, %52, %43 : vector<8x128xi1>, vector<8x128xf32>
    %54 = vector.extract_strided_slice %2 {offsets = [2, 0, 0], sizes = [1, 1, 1], strides = [1, 1, 1]} : vector<4x1x1xf32> to vector<1x1x1xf32>
    %55 = vector.shape_cast %54 : vector<1x1x1xf32> to vector<1x1xf32>
    %56 = vector.shape_cast %55 : vector<1x1xf32> to vector<1x1xf32>
    %57 = vector.broadcast %56 : vector<1x1xf32> to vector<8x128xf32>
    %58 = arith.select %50, %57, %48 : vector<8x128xi1>, vector<8x128xf32>
    %c3_i32 = arith.constant 3 : i32
    %59 = vector.broadcast %c3_i32 : i32 to vector<8x128xi32>
    %60 = arith.cmpi eq, %1, %59 : vector<8x128xi32>
    %61 = vector.extract_strided_slice %0 {offsets = [3, 0, 0], sizes = [1, 8, 128], strides = [1, 1, 1]} : vector<4x8x128xf32> to vector<1x8x128xf32>
    %62 = vector.shape_cast %61 : vector<1x8x128xf32> to vector<8x128xf32>
    %63 = arith.select %60, %62, %53 : vector<8x128xi1>, vector<8x128xf32>
    %64 = vector.extract_strided_slice %2 {offsets = [3, 0, 0], sizes = [1, 1, 1], strides = [1, 1, 1]} : vector<4x1x1xf32> to vector<1x1x1xf32>
    %65 = vector.shape_cast %64 : vector<1x1x1xf32> to vector<1x1xf32>
    %66 = vector.shape_cast %65 : vector<1x1xf32> to vector<1x1xf32>
    %67 = vector.broadcast %66 : vector<1x1xf32> to vector<8x128xf32>
    %68 = arith.select %60, %67, %58 : vector<8x128xi1>, vector<8x128xf32>
    %69 = arith.subf %63, %13 : vector<8x128xf32>
    %70 = math.log %32 : vector<8x128xf32>
    %71 = arith.subf %69, %70 : vector<8x128xf32>
    %72 = math.exp %71 : vector<8x128xf32>
    %cst = arith.constant 1.000000e+00 : f32
    %73 = vector.broadcast %cst : f32 to vector<8x128xf32>
    %74 = arith.subf %73, %72 : vector<8x128xf32>
    %cst_7 = arith.constant 0.000000e+00 : f32
    %cst_8 = arith.constant 1.000000e+00 : f32
    %75 = vector.broadcast %cst_7 : f32 to vector<8x128xf32>
    %76 = arith.maximumf %75, %74 : vector<8x128xf32>
    %77 = vector.broadcast %cst_8 : f32 to vector<8x128xf32>
    %78 = arith.minimumf %77, %76 : vector<8x128xf32>
    %79 = arith.mulf %78, %78 : vector<8x128xf32>
    %c128_i32 = arith.constant 128 : i32
    %80 = arith.muli %arg0, %c128_i32 : i32
    %81 = tpu.iota {dimensions = array<i32: 1>} : vector<8x128xi32>
    %82 = vector.broadcast %80 : i32 to vector<8x128xi32>
    %83 = arith.addi %82, %81 : vector<8x128xi32>
    %84 = tpu.iota {dimensions = array<i32: 0>} : vector<8x128xi32>
    %c8_i32 = arith.constant 8 : i32
    %85 = vector.broadcast %c8_i32 : i32 to vector<8x128xi32>
    %86 = arith.muli %83, %85 : vector<8x128xi32>
    %87 = arith.addi %86, %84 : vector<8x128xi32>
    %c0_9 = arith.constant 0 : index
    %88 = memref.load %arg1[%c0_9] : memref<1xi32, #tpu.memory_space<smem>>
    %89 = vector.broadcast %88 : i32 to vector<8x128xi32>
    %90 = arith.cmpi slt, %87, %89 : vector<8x128xi32>
    %cst_10 = arith.constant 0.000000e+00 : f32
    %91 = vector.broadcast %cst_10 : f32 to vector<8x128xf32>
    %92 = arith.subf %91, %68 : vector<8x128xf32>
    %93 = arith.mulf %92, %79 : vector<8x128xf32>
    %94 = arith.mulf %93, %71 : vector<8x128xf32>
    %cst_11 = arith.constant 0.000000e+00 : f32
    %95 = vector.broadcast %cst_11 : f32 to vector<8x128xf32>
    %96 = arith.select %90, %94, %95 : vector<8x128xi1>, vector<8x128xf32>
    %cst_12 = arith.constant dense<0.000000e+00> : vector<8xf32>
    %97 = vector.multi_reduction <add>, %96, %cst_12 [1] : vector<8x128xf32> to vector<8xf32>
    %98 = vector.shape_cast %97 : vector<8xf32> to vector<8x1xf32>
    %cst_13 = arith.constant dense<0.000000e+00> : vector<1xf32>
    %99 = vector.multi_reduction <add>, %98, %cst_13 [0] : vector<8x1xf32> to vector<1xf32>
    %100 = vector.shape_cast %99 : vector<1xf32> to vector<1x1xf32>
    %c0_14 = arith.constant 0 : index
    %c0_15 = arith.constant 0 : index
    %c0_16 = arith.constant 0 : index
    %101 = vector.load %arg5[%c0_14, %c0_15, %c0_16] : memref<1x1x1xf32, #tpu.memory_space<vmem>>, vector<1x1x1xf32>
    %102 = vector.shape_cast %101 : vector<1x1x1xf32> to vector<1x1xf32>
    %103 = vector.shape_cast %100 : vector<1x1xf32> to vector<1x1x1xf32>
    tpu.vector_store %arg5[%c0_14, %c0_15, %c0_16], %103 {strides = array<i32>} : memref<1x1x1xf32, #tpu.memory_space<vmem>>, vector<1x1x1xf32>,
    return
  }
  func.func @transform_0(%arg0: i32, %arg1: memref<1xi32, #tpu.memory_space<smem>>) -> (i32, i32) {
    %c0_i32 = arith.constant 0 : i32
    %c0_i32_0 = arith.constant 0 : i32
    return %c0_i32, %arg0 : i32, i32
  }
  func.func @transform_1(%arg0: i32, %arg1: memref<1xi32, #tpu.memory_space<smem>>) -> (i32, i32, i32) {
    %c0_i32 = arith.constant 0 : i32
    %c0_i32_0 = arith.constant 0 : i32
    %c0_i32_1 = arith.constant 0 : i32
    return %c0_i32, %c0_i32_0, %arg0 : i32, i32, i32
  }
  func.func @transform_2(%arg0: i32, %arg1: memref<1xi32, #tpu.memory_space<smem>>) -> (i32, i32, i32) {
    %c0_i32 = arith.constant 0 : i32
    %c0_i32_0 = arith.constant 0 : i32
    %c0_i32_1 = arith.constant 0 : i32
    %c0_i32_2 = arith.constant 0 : i32
    return %c0_i32, %c0_i32_0, %c0_i32_1 : i32, i32, i32
  }
  func.func @transform_3(%arg0: i32, %arg1: memref<1xi32, #tpu.memory_space<smem>>) -> (i32, i32, i32) {
    %c0_i32 = arith.constant 0 : i32
    %c0_i32_0 = arith.constant 0 : i32
    %c0_i32_1 = arith.constant 0 : i32
    return %arg0, %c0_i32, %c0_i32_0 : i32, i32, i32
  }
}

</mosaic_0001>

<bundles_post_ra>
// kernel: _focal_loss_impl.1
= control target key start
LH: loop header
LB: loop body
LE: loop exit
PB: predicated region body
PF: predicated region fallthrough
CT: control target
= control target key end

     0   :  { %v183_v2 = vmov 0   ;;  %s258_s0 = inlined_call_operand.<no memory space> [shape: s32[1], index: 0, kind: input, shape index: {}]   ;;  %s259_s1 = inlined_call_operand.vmem [shape: s32[8,128], index: 1, kind: input, shape index: {}]   ;;  %s260_s2 = inlined_call_operand.vmem [shape: f32[4,8,128], index: 2, kind: input, shape index: {}]   ;;  %s261_s3 = inlined_call_operand.vmem [shape: f32[4,1,1], index: 3, kind: input, shape index: {}]   ;;  %s262_s4 = inlined_call_operand.hbm [shape: f32[1,1,1], index: 4, kind: output, shape index: {}]  }
   0x1   :  { %v141_v0 = vld [vmem:[%s261_s3 + $0x2] ss:$0 sm:$0xff]  ;;  %v139_v1 = vld [vmem:[%s261_s3] ss:$0 sm:$0xff]  ;;  %146 = vset.pattern.permute.xlu1 %v183_v2  ;;  %145 = vset.pattern.permute.xlu0 %v183_v2  ;;  %v142_v3 = vld [vmem:[%s261_s3 + $0x3] ss:$0 sm:$0xff] }
   0x2   :  { %73 = vperm.xlu1 %146, %v141_v0   ;;  %50 = vperm.xlu0 %145, %v139_v1   ;;  %v140_v4 = vld [vmem:[%s261_s3 + $0x1] ss:$0 sm:$0xff] }
   0x3   :  { %10 = vsyncpa [#allocation5], 0  ;;  %v17_v5 = vld [vmem:[%s260_s2] sm:$0xff]  ;;  %v18_v6 = vld [vmem:[%s260_s2 + $0x8] sm:$0xff]  ;;  %v100_v38 = vlaneseq  ;;  %v109_v53 = vstv %s258_s0  ;;  %s184_s6 = smov [#allocation4]   ;;  %vm123_vm4 = vcmask 0  }
   0x4   :  { %v26_v7 = vmax.f32 %v17_v5, %v18_v6  ;;  %v19_v8 = vld [vmem:[%s260_s2 + $0x10] sm:$0xff]  ;;  %v20_v10 = vld [vmem:[%s260_s2 + $0x18] sm:$0xff]  ;;  %v21_v27 = vld [vmem:[%s259_s1] sm:$0xff]  ;;  %s131_s7 = sshll.u32 %s184_s6, 4  ;;  %s132_s7 = int_to_ptr.vmem [resolvable:$true] %s131_s7 }
   0x5   :  { %vm53_vm0 = vcmp.eq.s32.totalorder %v21_v27, 1  ;;  %vm65_vm1 = vcmp.eq.s32.totalorder %v21_v27, 2  ;;  %vm77_vm2 = vcmp.eq.s32.totalorder %v21_v27, 3  ;;  %v101_v40 = vand.u32 127, %v100_v38  ;;  %s159_s8 = scalar_lea.vmem %s132_s7, 16  ;;  %s163_s0 = scalar_lea.vmem %s132_s7, 32 }
   0x6   :  { %85 = vperm.xlu1 %146, %v142_v3   ;;  %61 = vperm.xlu0 %145, %v140_v4   ;;  %v27_v9 = vmax.f32 %v26_v7, %v19_v8  ;;  %v54_v28 = vsel %vm53_vm0, %v18_v6, %v17_v5  ;;  %v105_v44 = vshrl.u32 %v100_v38, 7  ;;  %p160_p0 = scmp.ne.s32.totalorder %s132_s7, %s159_s8  ;;  %p164_p1 = scmp.lt.s32.totalorder %s132_s7, %s132_s7 }
   0x7   :  { %v66_v29 = vsel %vm65_vm1, %v19_v8, %v54_v28  ;;  %v106_v45 = vmul.u32 8, %v101_v40  ;;  %p165_p2 = scmp.lt.s32.totalorder %s163_s0, %s159_s8 }
   0x8   :  { %v28_v11 = vmax.f32 %v27_v9, %v20_v10  ;;  %v78_v31 = vsel %vm77_vm2, %v20_v10, %v66_v29 }
   0x9   :  { %v107_v52 = vadd.s32 %v106_v45, %v105_v44  ;;  %p166_p3 = por %p165_p2, %p164_p1 }
   0xa   :  { %v29_v12 = vsub.f32 %v17_v5, %v28_v11  ;;  %v32_v13 = vsub.f32 %v18_v6, %v28_v11  ;;  %v36_v16 = vsub.f32 %v19_v8, %v28_v11  ;;  %v40_v18 = vsub.f32 %v20_v10, %v28_v11 }
   0xb   :  { %v89_v32 = vsub.f32 %v78_v31, %v28_v11  ;;  %vm110_vm3 = vcmp.lt.s32.totalorder %v107_v52, %v109_v53  ;;  %p167_p4 = pnand %p166_p3, %p160_p0 }
   0xc   :  { %v30_v14 = vmul.f32 1.442695, %v29_v12  ;;  %v33_v15 = vmul.f32 1.442695, %v32_v13  ;;  %v37_v17 = vmul.f32 1.442695, %v36_v16 }
   0xd   :  { %v41_v19 = vmul.f32 1.442695, %v40_v18 }
   0xe   :  { %147 = vpow2.f32 %v30_v14 }
   0xf   :  { %149 = vpow2.f32 %v33_v15 }
  0x10   :  { %151 = vpow2.f32 %v37_v17 }
  0x11   :  { %153 = vpow2.f32 %v41_v19 }
  0x18   :  { %v148_v20 = vpop.eup %147 }
  0x19   :  { %v150_v21 = vpop.eup %149 }
  0x1a   :  { %v35_v22 = vadd.f32 %v150_v21, %v148_v20  ;;  %v152_v23 = vpop.eup %151 }
  0x1b   :  { %v154_v25 = vpop.eup %153 }
  0x1c   :  { %v39_v24 = vadd.f32 %v152_v23, %v35_v22 }
  0x1e   :  { %v43_v26 = vadd.f32 %v154_v25, %v39_v24 }
  0x20   :  { %155 = vlog2.f32 %v43_v26 }
  0x2a   :  { %v156_v30 = vpop.eup %155 }
  0x2b   :  { %v91_v33 = vmul.f32 0.6931472, %v156_v30 }
  0x2d   :  { %v92_v34 = vsub.f32 %v89_v32, %v91_v33 }
  0x2f   :  { %v93_v35 = vmul.f32 1.442695, %v92_v34 }
  0x31   :  { %157 = vpow2.f32 %v93_v35 }
  0x3b   :  { %v158_v36 = vpop.eup %157 }
  0x3c   :  { %v95_v37 = vsub.f32 1.0, %v158_v36 }
  0x3e   :  { %v96_v39 = vmax.f32 %v95_v37, 0.0 }
  0x40   :  { %v97_v43 = vmin.f32 %v96_v39, 1.0 }
  0x42   :  { %v98_v50 = vmul.f32 %v97_v43, %v97_v43 }
  0x81   :  { %v74_v41 = vpop.permute.xlu1 %73  ;;  %v51_v42 = vpop.permute.xlu0 %50 }
  0x85   :  { %v62_v46 = vpop.permute.xlu0 %61  ;;  %v86_v48 = vpop.permute.xlu1 %85 }
  0x86   :  { %v64_v47 = vsel %vm53_vm0, %v62_v46, %v51_v42 }
  0x87   :  { %v76_v49 = vsel %vm65_vm1, %v74_v41, %v64_v47 }
  0x88   :  { %v88_v51 = vsel %vm77_vm2, %v86_v48, %v76_v49 }
  0x89   :  { %v111_v54 = vsub.f32 0.0, %v88_v51 }
  0x8b   :  { %v112_v55 = vmul.f32 %v111_v54, %v98_v50 }
  0x8d   :  { %v113_v56 = vmul.f32 %v112_v55, %v92_v34 }
  0x8f   :  { %v114_v57 = vsel %vm110_vm3, %v113_v56, 0.0 }
  0x90   :  { %115 = vadd.xlane.f32.xlu0 %v114_v57 }
 0x11d   :  { %v116_v58 = vpop.xlane.xlu0 %115 }
 0x11e   :  { %v117_v59 = vrot.slane %v116_v58, 4 }
 0x120   :  { %v118_v60 = vadd.f32 %v117_v59, %v116_v58 }
 0x122   :  { %v119_v61 = vrot.slane %v118_v60, 2 }
 0x124   :  { %v120_v62 = vadd.f32 %v119_v61, %v118_v60 }
 0x126   :  { %v121_v63 = vrot.slane %v120_v62, 1 }
 0x128   :  { %v122_v0 = vadd.f32 %v121_v63, %v120_v62 }
 0x12a   :  { %124 = vst.msk [vmem:[#allocation4] sm:$0x1] %vm123_vm4, %v122_v0 }
 0x12b   :  { %170 = shalt.err (!%p167_p4)
}
 0x12c   :  { %s171_s11 = scalar_lea.hbm %s262_s4, 16 }
 0x12d   :  { %p172_p5 = scmp.ne.s32.totalorder %s262_s4, %s171_s11  ;;  %p175_p6 = scmp.lt.u32.totalorder %s171_s11, %s262_s4 }
 0x12f   :  { %p177_p7 = pnand %p175_p6, %p172_p5 }
 0x131   :  { %180 = shalt.err (!%p177_p7)
}
 0x132   :  { %134 = dma.vmem_to_hbm [thread:$0]  %s132_s7, 16, %s262_s4, [#allocation5]  }
 0x133   :  { %181 = dma.done.wait [#allocation5], 16  }
 0x134   :  { %182 = vsyncadd [#allocation5], 4294967280 }
 0x135   :  { %138 = vsyncpa [#allocation5], 1 }

</bundles_post_ra>
